<compile_context>
chip_gen: v6e
topology: v6e:2x2x1
jax: 0.10.0
libtpu: 0.0.40
codegen_flags: <defaults>
</compile_context>

<pallas_src>
import functools

import jax
import jax.numpy as jnp
from jax.experimental import pallas as pl
from jax.experimental.pallas import tpu as pltpu


def _lm_head_kernel(x_ref, wd_ref, bd_ref, gamma_ref, beta_ref,
                    wdec_ref, bdec_ref, out_ref, hn_ref, *, eps):
    j = pl.program_id(1)  # vocab-tile index (inner, sequential axis)

    # dense + GELU + LayerNorm only once per row tile (first vocab tile);
    # result cached in VMEM scratch (decoder-weight dtype) and reused for
    # every vocab tile.
    @pl.when(j == 0)
    def _():
        # --- dense: Linear(H -> H), f32 accumulation on the MXU ---
        h = jnp.dot(x_ref[...], wd_ref[...],
                    preferred_element_type=jnp.float32)
        h = h + bd_ref[...].astype(jnp.float32)        # bias broadcast over rows

        # --- exact GELU (erf form), matches torch.nn.functional.gelu default ---
        h = 0.5 * h * (1.0 + jax.lax.erf(h * 0.7071067811865476))

        # --- LayerNorm over last dim (biased variance, like nn.LayerNorm) ---
        mean = jnp.mean(h, axis=-1, keepdims=True)
        var = jnp.mean((h - mean) * (h - mean), axis=-1, keepdims=True)
        hn = (h - mean) * jax.lax.rsqrt(var + eps)
        hn = hn * gamma_ref[...].astype(jnp.float32) \
             + beta_ref[...].astype(jnp.float32)
        # Single cast into the MXU-input dtype; no per-vocab-step cast later.
        hn_ref[...] = hn.astype(hn_ref.dtype)

    # --- decoder: Linear(H -> V) + tied bias, one vocab tile per step ---
    logits = jnp.dot(hn_ref[...], wdec_ref[...],
                     preferred_element_type=jnp.float32)
    logits = logits + bdec_ref[...].astype(jnp.float32)
    out_ref[...] = logits.astype(out_ref.dtype)


def _round_up(x, m):
    return (x + m - 1) // m * m


def _vmem_limit_bytes():
    """Per-generation scoped VMEM limit with headroom for Mosaic scratch."""
    cap = 128 * 1024 * 1024
    try:
        info = pltpu.get_tpu_info()
        cap = int(getattr(info, "vmem_capacity_bytes", cap)) or cap
    except Exception:
        pass
    # ~54 MiB on 64-MiB v7x, ~109 MiB on 128-MiB v5e/v6e.
    return min(int(cap * 0.85), 112 * 1024 * 1024)


def roberta_ctc_lm_head(features, params, *, eps=1e-5,
                        row_tile=None, vocab_tile=2048, out_dtype=None):
    """features: [B, T, H] -> logits: [B, T, V]."""
    B, T, H = features.shape
    wd, bd, gamma, beta, wdec, bdec = params
    V = wdec.shape[1]
    out_dtype = features.dtype if out_dtype is None else jnp.dtype(out_dtype)

    x = features.reshape(B * T, H)
    N = x.shape[0]

    vmem_limit = _vmem_limit_bytes()
    if row_tile is None:
        # Bigger row tiles on 128-MiB-VMEM parts (v5e/v6e); 512 on v7x.
        row_tile = 1024 if vmem_limit >= 96 * 1024 * 1024 else 512

    # Row alignment: keep sublane packing clean for sub-32-bit dtypes.
    itemsize = jnp.dtype(x.dtype).itemsize
    row_align = {4: 8, 2: 16, 1: 32}.get(itemsize, 8)

    n_aligned = _round_up(N, row_align)
    row_tile = min(row_tile, n_aligned)
    # Keep >= 2 row tiles when there's enough work: row axis is the
    # "parallel"/megacore axis, so both v7x TensorCores stay busy.
    if n_aligned // row_tile < 2 and n_aligned >= 2 * row_align:
        row_tile = _round_up(pl.cdiv(n_aligned, 2), row_align)
    vocab_tile = min(vocab_tile, _round_up(V, 128))

    # Pad rows / vocab so the grid covers everything with full tiles.
    Np = _round_up(N, row_tile)
    Vp = _round_up(V, vocab_tile)
    if Np != N:
        x = jnp.pad(x, ((0, Np - N), (0, 0)))
    if Vp != V:
        wdec = jnp.pad(wdec, ((0, 0), (0, Vp - V)))
        bdec = jnp.pad(bdec, (0, Vp - V))

    # biases / LN params as 2D [1, dim] so they live cleanly in VMEM tiles
    bd2 = bd.reshape(1, H)
    gamma2 = gamma.reshape(1, H)
    beta2 = beta.reshape(1, H)
    bdec2 = bdec.reshape(1, Vp)

    grid = (Np // row_tile, Vp // vocab_tile)
    n_row_tiles = grid[0]
    kernel = functools.partial(_lm_head_kernel, eps=eps)

    # Honest byte estimate: x / dense weights streamed once, decoder weights
    # re-streamed once per row tile, full (padded) logits written once.
    cost = pl.CostEstimate(
        flops=2 * N * H * (H + Vp),
        transcendentals=N * H,
        bytes_accessed=(x.size * jnp.dtype(x.dtype).itemsize
                        + wd.size * jnp.dtype(wd.dtype).itemsize
                        + n_row_tiles * wdec.size * jnp.dtype(wdec.dtype).itemsize
                        + Np * Vp * jnp.dtype(out_dtype).itemsize),
    )

    def _build(single_buffer_constants):
        # Blocks whose index never changes inside the vocab sweep don't need
        # double-buffering; Buffered(1) frees that VMEM for bigger tiles.
        pm_kw = ({"pipeline_mode": pl.Buffered(1)}
                 if single_buffer_constants else {})
        return pl.pallas_call(
            kernel,
            out_shape=jax.ShapeDtypeStruct((Np, Vp), out_dtype),
            grid_spec=pltpu.PrefetchScalarGridSpec(
                num_scalar_prefetch=0,
                grid=grid,
                in_specs=[
                    pl.BlockSpec((row_tile, H), lambda i, j: (i, 0), **pm_kw),  # x rows
                    pl.BlockSpec((H, H), lambda i, j: (0, 0), **pm_kw),         # dense W (pre-T)
                    pl.BlockSpec((1, H), lambda i, j: (0, 0), **pm_kw),         # dense b
                    pl.BlockSpec((1, H), lambda i, j: (0, 0), **pm_kw),         # LN gamma
                    pl.BlockSpec((1, H), lambda i, j: (0, 0), **pm_kw),         # LN beta
                    pl.BlockSpec((H, vocab_tile), lambda i, j: (0, j)),         # decoder W tile
                    pl.BlockSpec((1, vocab_tile), lambda i, j: (0, j)),         # decoder bias tile
                ],
                out_specs=pl.BlockSpec((row_tile, vocab_tile),
                                       lambda i, j: (i, j)),
                # hn cached in the decoder-weight dtype (bf16 for bf16 weights).
                scratch_shapes=[pltpu.VMEM((row_tile, H), wdec.dtype)],
            ),
            compiler_params=pltpu.CompilerParams(
                # vocab axis must be sequential: hn scratch is filled on j == 0.
                dimension_semantics=("parallel", "arbitrary"),
                vmem_limit_bytes=vmem_limit,
            ),
            cost_estimate=cost,
        )

    args = (x, wd, bd2, gamma2, beta2, wdec, bdec2)
    use_single = hasattr(pl, "Buffered")
    try:
        out = _build(use_single)(*args)
    except Exception:
        if not use_single:
            raise
        # Fallback for JAX versions where single-buffer pipeline_mode is
        # unsupported: identical math, default double-buffering.
        out = _build(False)(*args)

    # Strip row / vocab padding.
    return out[:N, :V].reshape(B, T, V)


def _reference(features, params, eps=1e-5):
    wd, bd, gamma, beta, wdec, bdec = params
    x = features.astype(jnp.float32)
    h = x @ wd + bd
    h = 0.5 * h * (1.0 + jax.lax.erf(h * 0.7071067811865476))
    mean = jnp.mean(h, axis=-1, keepdims=True)
    var = jnp.mean((h - mean) ** 2, axis=-1, keepdims=True)
    hn = (h - mean) * jax.lax.rsqrt(var + eps)
    hn = hn * gamma + beta
    return hn @ wdec + bdec


if __name__ == "__main__":
    # Small config: batch=2, seq=8, hidden=32, vocab=320
    # (vocab chosen non-multiple-of-128 to exercise V padding + multi-tile grid)
    B, T, H, V = 2, 8, 32, 320
    eps = 1e-5

    key = jax.random.PRNGKey(0)
    k = jax.random.split(key, 6)
    features = jax.random.normal(k[0], (B, T, H), dtype=jnp.float32)

    # Deterministic synthetic parameters (shapes from the module's __init__).
    wd = jax.random.normal(k[1], (H, H), dtype=jnp.float32) * 0.02    # dense.weight.T
    bd = jax.random.normal(k[2], (H,), dtype=jnp.float32) * 0.02      # dense.bias
    gamma = jnp.ones((H,), dtype=jnp.float32)                         # layer_norm.weight
    beta = jnp.zeros((H,), dtype=jnp.float32)                         # layer_norm.bias
    wdec = jax.random.normal(k[3], (H, V), dtype=jnp.float32) * 0.02  # decoder.weight.T
    bdec = jnp.zeros((V,), dtype=jnp.float32)                         # tied bias (init zeros)

    params = (wd, bd, gamma, beta, wdec, bdec)

    # vocab_tile=128 so the tiny demo still exercises the 2-D grid, the
    # hn-caching path across multiple vocab tiles, and multiple row tiles.
    out = roberta_ctc_lm_head(features, params, eps=eps, vocab_tile=128)
    out = jax.block_until_ready(out)

    ref = _reference(features, params, eps=eps)
    assert out.shape == (B, T, V)
    assert jnp.allclose(out, ref, atol=1e-4, rtol=1e-4)

    print("KERNEL_OK")
</pallas_src>

<mosaic_0001>
module attributes {stable_mosaic.version = 11 : i64} {
  func.func @_lm_head_kernel(%arg0: i32, %arg1: i32, %arg2: memref<8x32xf32, #tpu.memory_space<vmem>>, %arg3: memref<32x32xf32, #tpu.memory_space<vmem>>, %arg4: memref<1x32xf32, #tpu.memory_space<vmem>>, %arg5: memref<1x32xf32, #tpu.memory_space<vmem>>, %arg6: memref<1x32xf32, #tpu.memory_space<vmem>>, %arg7: memref<32x128xf32, #tpu.memory_space<vmem>>, %arg8: memref<1x128xf32, #tpu.memory_space<vmem>>, %arg9: memref<8x128xf32, #tpu.memory_space<vmem>>, %arg10: memref<8x32xf32, #tpu.memory_space<vmem>>) attributes {dimension_semantics = [#tpu.dimension_semantics<parallel>, #tpu.dimension_semantics<arbitrary>], iteration_bounds = array<i64: 2, 3>, scalar_prefetch = 0 : i64, scratch_operands = 1 : i64, tpu.core_type = #tpu.core_type<tc>, window_params = [{pipeline_mode = #tpu.pipeline_mode<synchronous>, transform_indices = @transform_0, window_bounds = array<i64: 8, 32>}, {pipeline_mode = #tpu.pipeline_mode<synchronous>, transform_indices = @transform_1, window_bounds = array<i64: 32, 32>}, {pipeline_mode = #tpu.pipeline_mode<synchronous>, transform_indices = @transform_2, window_bounds = array<i64: 1, 32>}, {pipeline_mode = #tpu.pipeline_mode<synchronous>, transform_indices = @transform_3, window_bounds = array<i64: 1, 32>}, {pipeline_mode = #tpu.pipeline_mode<synchronous>, transform_indices = @transform_4, window_bounds = array<i64: 1, 32>}, {transform_indices = @transform_5, window_bounds = array<i64: 32, 128>}, {transform_indices = @transform_6, window_bounds = array<i64: 1, 128>}, {transform_indices = @transform_7, window_bounds = array<i64: 8, 128>}]} {
    %c0_i32 = arith.constant 0 : i32
    %0 = arith.cmpi eq, %arg1, %c0_i32 : i32
    %1 = arith.extui %0 : i1 to i32
    %c0_i32_0 = arith.constant 0 : i32
    %2 = arith.cmpi ne, %1, %c0_i32_0 : i32
    scf.if %2 {
      %c0_8 = arith.constant 0 : index
      %c0_9 = arith.constant 0 : index
      %10 = vector.load %arg2[%c0_8, %c0_9] : memref<8x32xf32, #tpu.memory_space<vmem>>, vector<8x32xf32>
      %c0_10 = arith.constant 0 : index
      %c0_11 = arith.constant 0 : index
      %11 = vector.load %arg3[%c0_10, %c0_11] : memref<32x32xf32, #tpu.memory_space<vmem>>, vector<32x32xf32>
      %cst_12 = arith.constant dense<0.000000e+00> : vector<8x32xf32>
      %12 = tpu.matmul %10, %11, %cst_12 {dimension_numbers = #tpu.dot_dimension_numbers<[1], [0], [0], [1], [0, 0, 1, 1], [], []>} : vector<8x32xf32>, vector<32x32xf32>, vector<8x32xf32> -> vector<8x32xf32>
      %c0_13 = arith.constant 0 : index
      %c0_14 = arith.constant 0 : index
      %13 = vector.load %arg4[%c0_13, %c0_14] : memref<1x32xf32, #tpu.memory_space<vmem>>, vector<1x32xf32>
      %14 = vector.broadcast %13 : vector<1x32xf32> to vector<8x32xf32>
      %15 = arith.addf %12, %14 : vector<8x32xf32>
      %cst_15 = arith.constant 5.000000e-01 : f32
      %16 = vector.broadcast %cst_15 : f32 to vector<8x32xf32>
      %17 = arith.mulf %16, %15 : vector<8x32xf32>
      %cst_16 = arith.constant 0.707106769 : f32
      %18 = vector.broadcast %cst_16 : f32 to vector<8x32xf32>
      %19 = arith.mulf %15, %18 : vector<8x32xf32>
      %20 = math.erf %19 : vector<8x32xf32>
      %cst_17 = arith.constant 1.000000e+00 : f32
      %21 = vector.broadcast %cst_17 : f32 to vector<8x32xf32>
      %22 = arith.addf %21, %20 : vector<8x32xf32>
      %23 = arith.mulf %17, %22 : vector<8x32xf32>
      %cst_18 = arith.constant dense<0.000000e+00> : vector<8xf32>
      %24 = vector.multi_reduction <add>, %23, %cst_18 [1] : vector<8x32xf32> to vector<8xf32>
      %25 = vector.shape_cast %24 : vector<8xf32> to vector<8x1xf32>
      %cst_19 = arith.constant 3.200000e+01 : f32
      %26 = vector.broadcast %cst_19 : f32 to vector<8x1xf32>
      %27 = arith.divf %25, %26 : vector<8x1xf32>
      %28 = vector.broadcast %27 : vector<8x1xf32> to vector<8x32xf32>
      %29 = arith.subf %23, %28 : vector<8x32xf32>
      %30 = vector.broadcast %27 : vector<8x1xf32> to vector<8x32xf32>
      %31 = arith.subf %23, %30 : vector<8x32xf32>
      %32 = arith.mulf %29, %31 : vector<8x32xf32>
      %cst_20 = arith.constant dense<0.000000e+00> : vector<8xf32>
      %33 = vector.multi_reduction <add>, %32, %cst_20 [1] : vector<8x32xf32> to vector<8xf32>
      %34 = vector.shape_cast %33 : vector<8xf32> to vector<8x1xf32>
      %cst_21 = arith.constant 3.200000e+01 : f32
      %35 = vector.broadcast %cst_21 : f32 to vector<8x1xf32>
      %36 = arith.divf %34, %35 : vector<8x1xf32>
      %37 = vector.broadcast %27 : vector<8x1xf32> to vector<8x32xf32>
      %38 = arith.subf %23, %37 : vector<8x32xf32>
      %cst_22 = arith.constant 9.99999974E-6 : f32
      %39 = vector.broadcast %cst_22 : f32 to vector<8x1xf32>
      %40 = arith.addf %36, %39 : vector<8x1xf32>
      %41 = math.rsqrt %40 : vector<8x1xf32>
      %42 = vector.broadcast %41 : vector<8x1xf32> to vector<8x32xf32>
      %43 = arith.mulf %38, %42 : vector<8x32xf32>
      %c0_23 = arith.constant 0 : index
      %c0_24 = arith.constant 0 : index
      %44 = vector.load %arg5[%c0_23, %c0_24] : memref<1x32xf32, #tpu.memory_space<vmem>>, vector<1x32xf32>
      %45 = vector.broadcast %44 : vector<1x32xf32> to vector<8x32xf32>
      %46 = arith.mulf %43, %45 : vector<8x32xf32>
      %c0_25 = arith.constant 0 : index
      %c0_26 = arith.constant 0 : index
      %47 = vector.load %arg6[%c0_25, %c0_26] : memref<1x32xf32, #tpu.memory_space<vmem>>, vector<1x32xf32>
      %48 = vector.broadcast %47 : vector<1x32xf32> to vector<8x32xf32>
      %49 = arith.addf %46, %48 : vector<8x32xf32>
      %c0_27 = arith.constant 0 : index
      %c0_28 = arith.constant 0 : index
      %50 = vector.load %arg10[%c0_27, %c0_28] : memref<8x32xf32, #tpu.memory_space<vmem>>, vector<8x32xf32>
      tpu.vector_store %arg10[%c0_27, %c0_28], %49 {strides = array<i32>} : memref<8x32xf32, #tpu.memory_space<vmem>>, vector<8x32xf32>,
    } else {
    }
    %c0 = arith.constant 0 : index
    %c0_1 = arith.constant 0 : index
    %3 = vector.load %arg10[%c0, %c0_1] : memref<8x32xf32, #tpu.memory_space<vmem>>, vector<8x32xf32>
    %c0_2 = arith.constant 0 : index
    %c0_3 = arith.constant 0 : index
    %4 = vector.load %arg7[%c0_2, %c0_3] : memref<32x128xf32, #tpu.memory_space<vmem>>, vector<32x128xf32>
    %cst = arith.constant dense<0.000000e+00> : vector<8x128xf32>
    %5 = tpu.matmul %3, %4, %cst {dimension_numbers = #tpu.dot_dimension_numbers<[1], [0], [0], [1], [0, 0, 1, 1], [], []>} : vector<8x32xf32>, vector<32x128xf32>, vector<8x128xf32> -> vector<8x128xf32>
    %c0_4 = arith.constant 0 : index
    %c0_5 = arith.constant 0 : index
    %6 = vector.load %arg8[%c0_4, %c0_5] : memref<1x128xf32, #tpu.memory_space<vmem>>, vector<1x128xf32>
    %7 = vector.broadcast %6 : vector<1x128xf32> to vector<8x128xf32>
    %8 = arith.addf %5, %7 : vector<8x128xf32>
    %c0_6 = arith.constant 0 : index
    %c0_7 = arith.constant 0 : index
    %9 = vector.load %arg9[%c0_6, %c0_7] : memref<8x128xf32, #tpu.memory_space<vmem>>, vector<8x128xf32>
    tpu.vector_store %arg9[%c0_6, %c0_7], %8 {strides = array<i32>} : memref<8x128xf32, #tpu.memory_space<vmem>>, vector<8x128xf32>,
    return
  }
  func.func @transform_0(%arg0: i32, %arg1: i32) -> (i32, i32) {
    %c0_i32 = arith.constant 0 : i32
    %c0_i32_0 = arith.constant 0 : i32
    return %arg0, %c0_i32 : i32, i32
  }
  func.func @transform_1(%arg0: i32, %arg1: i32) -> (i32, i32) {
    %c0_i32 = arith.constant 0 : i32
    %c0_i32_0 = arith.constant 0 : i32
    %c0_i32_1 = arith.constant 0 : i32
    return %c0_i32, %c0_i32_0 : i32, i32
  }
  func.func @transform_2(%arg0: i32, %arg1: i32) -> (i32, i32) {
    %c0_i32 = arith.constant 0 : i32
    %c0_i32_0 = arith.constant 0 : i32
    %c0_i32_1 = arith.constant 0 : i32
    return %c0_i32, %c0_i32_0 : i32, i32
  }
  func.func @transform_3(%arg0: i32, %arg1: i32) -> (i32, i32) {
    %c0_i32 = arith.constant 0 : i32
    %c0_i32_0 = arith.constant 0 : i32
    %c0_i32_1 = arith.constant 0 : i32
    return %c0_i32, %c0_i32_0 : i32, i32
  }
  func.func @transform_4(%arg0: i32, %arg1: i32) -> (i32, i32) {
    %c0_i32 = arith.constant 0 : i32
    %c0_i32_0 = arith.constant 0 : i32
    %c0_i32_1 = arith.constant 0 : i32
    return %c0_i32, %c0_i32_0 : i32, i32
  }
  func.func @transform_5(%arg0: i32, %arg1: i32) -> (i32, i32) {
    %c0_i32 = arith.constant 0 : i32
    %c0_i32_0 = arith.constant 0 : i32
    return %c0_i32, %arg1 : i32, i32
  }
  func.func @transform_6(%arg0: i32, %arg1: i32) -> (i32, i32) {
    %c0_i32 = arith.constant 0 : i32
    %c0_i32_0 = arith.constant 0 : i32
    return %c0_i32, %arg1 : i32, i32
  }
  func.func @transform_7(%arg0: i32, %arg1: i32) -> (i32, i32) {
    %c0_i32 = arith.constant 0 : i32
    return %arg0, %arg1 : i32, i32
  }
}

module attributes {stable_mosaic.version = 11 : i64} {
  func.func @_lm_head_kernel(%arg0: i32, %arg1: i32, %arg2: memref<8x32xf32, #tpu.memory_space<vmem>>, %arg3: memref<32x32xf32, #tpu.memory_space<vmem>>, %arg4: memref<1x32xf32, #tpu.memory_space<vmem>>, %arg5: memref<1x32xf32, #tpu.memory_space<vmem>>, %arg6: memref<1x32xf32, #tpu.memory_space<vmem>>, %arg7: memref<32x128xf32, #tpu.memory_space<vmem>>, %arg8: memref<1x128xf32, #tpu.memory_space<vmem>>, %arg9: memref<8x128xf32, #tpu.memory_space<vmem>>, %arg10: memref<8x32xf32, #tpu.memory_space<vmem>>) attributes {dimension_semantics = [#tpu.dimension_semantics<parallel>, #tpu.dimension_semantics<arbitrary>], iteration_bounds = array<i64: 2, 3>, scalar_prefetch = 0 : i64, scratch_operands = 1 : i64, tpu.core_type = #tpu.core_type<tc>, window_params = [{transform_indices = @transform_0, window_bounds = array<i64: 8, 32>}, {pipeline_mode = #tpu.pipeline_mode<synchronous>, transform_indices = @transform_1, window_bounds = array<i64: 32, 32>}, {pipeline_mode = #tpu.pipeline_mode<synchronous>, transform_indices = @transform_2, window_bounds = array<i64: 1, 32>}, {pipeline_mode = #tpu.pipeline_mode<synchronous>, transform_indices = @transform_3, window_bounds = array<i64: 1, 32>}, {pipeline_mode = #tpu.pipeline_mode<synchronous>, transform_indices = @transform_4, window_bounds = array<i64: 1, 32>}, {transform_indices = @transform_5, window_bounds = array<i64: 32, 128>}, {transform_indices = @transform_6, window_bounds = array<i64: 1, 128>}, {transform_indices = @transform_7, window_bounds = array<i64: 8, 128>}]} {
    %c0_i32 = arith.constant 0 : i32
    %0 = arith.cmpi eq, %arg1, %c0_i32 : i32
    %1 = arith.extui %0 : i1 to i32
    %c0_i32_0 = arith.constant 0 : i32
    %2 = arith.cmpi ne, %1, %c0_i32_0 : i32
    scf.if %2 {
      %c0_8 = arith.constant 0 : index
      %c0_9 = arith.constant 0 : index
      %10 = vector.load %arg2[%c0_8, %c0_9] : memref<8x32xf32, #tpu.memory_space<vmem>>, vector<8x32xf32>
      %c0_10 = arith.constant 0 : index
      %c0_11 = arith.constant 0 : index
      %11 = vector.load %arg3[%c0_10, %c0_11] : memref<32x32xf32, #tpu.memory_space<vmem>>, vector<32x32xf32>
      %cst_12 = arith.constant dense<0.000000e+00> : vector<8x32xf32>
      %12 = tpu.matmul %10, %11, %cst_12 {dimension_numbers = #tpu.dot_dimension_numbers<[1], [0], [0], [1], [0, 0, 1, 1], [], []>} : vector<8x32xf32>, vector<32x32xf32>, vector<8x32xf32> -> vector<8x32xf32>
      %c0_13 = arith.constant 0 : index
      %c0_14 = arith.constant 0 : index
      %13 = vector.load %arg4[%c0_13, %c0_14] : memref<1x32xf32, #tpu.memory_space<vmem>>, vector<1x32xf32>
      %14 = vector.broadcast %13 : vector<1x32xf32> to vector<8x32xf32>
      %15 = arith.addf %12, %14 : vector<8x32xf32>
      %cst_15 = arith.constant 5.000000e-01 : f32
      %16 = vector.broadcast %cst_15 : f32 to vector<8x32xf32>
      %17 = arith.mulf %16, %15 : vector<8x32xf32>
      %cst_16 = arith.constant 0.707106769 : f32
      %18 = vector.broadcast %cst_16 : f32 to vector<8x32xf32>
      %19 = arith.mulf %15, %18 : vector<8x32xf32>
      %20 = math.erf %19 : vector<8x32xf32>
      %cst_17 = arith.constant 1.000000e+00 : f32
      %21 = vector.broadcast %cst_17 : f32 to vector<8x32xf32>
      %22 = arith.addf %21, %20 : vector<8x32xf32>
      %23 = arith.mulf %17, %22 : vector<8x32xf32>
      %cst_18 = arith.constant dense<0.000000e+00> : vector<8xf32>
      %24 = vector.multi_reduction <add>, %23, %cst_18 [1] : vector<8x32xf32> to vector<8xf32>
      %25 = vector.shape_cast %24 : vector<8xf32> to vector<8x1xf32>
      %cst_19 = arith.constant 3.200000e+01 : f32
      %26 = vector.broadcast %cst_19 : f32 to vector<8x1xf32>
      %27 = arith.divf %25, %26 : vector<8x1xf32>
      %28 = vector.broadcast %27 : vector<8x1xf32> to vector<8x32xf32>
      %29 = arith.subf %23, %28 : vector<8x32xf32>
      %30 = vector.broadcast %27 : vector<8x1xf32> to vector<8x32xf32>
      %31 = arith.subf %23, %30 : vector<8x32xf32>
      %32 = arith.mulf %29, %31 : vector<8x32xf32>
      %cst_20 = arith.constant dense<0.000000e+00> : vector<8xf32>
      %33 = vector.multi_reduction <add>, %32, %cst_20 [1] : vector<8x32xf32> to vector<8xf32>
      %34 = vector.shape_cast %33 : vector<8xf32> to vector<8x1xf32>
      %cst_21 = arith.constant 3.200000e+01 : f32
      %35 = vector.broadcast %cst_21 : f32 to vector<8x1xf32>
      %36 = arith.divf %34, %35 : vector<8x1xf32>
      %37 = vector.broadcast %27 : vector<8x1xf32> to vector<8x32xf32>
      %38 = arith.subf %23, %37 : vector<8x32xf32>
      %cst_22 = arith.constant 9.99999974E-6 : f32
      %39 = vector.broadcast %cst_22 : f32 to vector<8x1xf32>
      %40 = arith.addf %36, %39 : vector<8x1xf32>
      %41 = math.rsqrt %40 : vector<8x1xf32>
      %42 = vector.broadcast %41 : vector<8x1xf32> to vector<8x32xf32>
      %43 = arith.mulf %38, %42 : vector<8x32xf32>
      %c0_23 = arith.constant 0 : index
      %c0_24 = arith.constant 0 : index
      %44 = vector.load %arg5[%c0_23, %c0_24] : memref<1x32xf32, #tpu.memory_space<vmem>>, vector<1x32xf32>
      %45 = vector.broadcast %44 : vector<1x32xf32> to vector<8x32xf32>
      %46 = arith.mulf %43, %45 : vector<8x32xf32>
      %c0_25 = arith.constant 0 : index
      %c0_26 = arith.constant 0 : index
      %47 = vector.load %arg6[%c0_25, %c0_26] : memref<1x32xf32, #tpu.memory_space<vmem>>, vector<1x32xf32>
      %48 = vector.broadcast %47 : vector<1x32xf32> to vector<8x32xf32>
      %49 = arith.addf %46, %48 : vector<8x32xf32>
      %c0_27 = arith.constant 0 : index
      %c0_28 = arith.constant 0 : index
      %50 = vector.load %arg10[%c0_27, %c0_28] : memref<8x32xf32, #tpu.memory_space<vmem>>, vector<8x32xf32>
      tpu.vector_store %arg10[%c0_27, %c0_28], %49 {strides = array<i32>} : memref<8x32xf32, #tpu.memory_space<vmem>>, vector<8x32xf32>,
    } else {
    }
    %c0 = arith.constant 0 : index
    %c0_1 = arith.constant 0 : index
    %3 = vector.load %arg10[%c0, %c0_1] : memref<8x32xf32, #tpu.memory_space<vmem>>, vector<8x32xf32>
    %c0_2 = arith.constant 0 : index
    %c0_3 = arith.constant 0 : index
    %4 = vector.load %arg7[%c0_2, %c0_3] : memref<32x128xf32, #tpu.memory_space<vmem>>, vector<32x128xf32>
    %cst = arith.constant dense<0.000000e+00> : vector<8x128xf32>
    %5 = tpu.matmul %3, %4, %cst {dimension_numbers = #tpu.dot_dimension_numbers<[1], [0], [0], [1], [0, 0, 1, 1], [], []>} : vector<8x32xf32>, vector<32x128xf32>, vector<8x128xf32> -> vector<8x128xf32>
    %c0_4 = arith.constant 0 : index
    %c0_5 = arith.constant 0 : index
    %6 = vector.load %arg8[%c0_4, %c0_5] : memref<1x128xf32, #tpu.memory_space<vmem>>, vector<1x128xf32>
    %7 = vector.broadcast %6 : vector<1x128xf32> to vector<8x128xf32>
    %8 = arith.addf %5, %7 : vector<8x128xf32>
    %c0_6 = arith.constant 0 : index
    %c0_7 = arith.constant 0 : index
    %9 = vector.load %arg9[%c0_6, %c0_7] : memref<8x128xf32, #tpu.memory_space<vmem>>, vector<8x128xf32>
    tpu.vector_store %arg9[%c0_6, %c0_7], %8 {strides = array<i32>} : memref<8x128xf32, #tpu.memory_space<vmem>>, vector<8x128xf32>,
    return
  }
  func.func @transform_0(%arg0: i32, %arg1: i32) -> (i32, i32) {
    %c0_i32 = arith.constant 0 : i32
    %c0_i32_0 = arith.constant 0 : i32
    return %arg0, %c0_i32 : i32, i32
  }
  func.func @transform_1(%arg0: i32, %arg1: i32) -> (i32, i32) {
    %c0_i32 = arith.constant 0 : i32
    %c0_i32_0 = arith.constant 0 : i32
    %c0_i32_1 = arith.constant 0 : i32
    return %c0_i32, %c0_i32_0 : i32, i32
  }
  func.func @transform_2(%arg0: i32, %arg1: i32) -> (i32, i32) {
    %c0_i32 = arith.constant 0 : i32
    %c0_i32_0 = arith.constant 0 : i32
    %c0_i32_1 = arith.constant 0 : i32
    return %c0_i32, %c0_i32_0 : i32, i32
  }
  func.func @transform_3(%arg0: i32, %arg1: i32) -> (i32, i32) {
    %c0_i32 = arith.constant 0 : i32
    %c0_i32_0 = arith.constant 0 : i32
    %c0_i32_1 = arith.constant 0 : i32
    return %c0_i32, %c0_i32_0 : i32, i32
  }
  func.func @transform_4(%arg0: i32, %arg1: i32) -> (i32, i32) {
    %c0_i32 = arith.constant 0 : i32
    %c0_i32_0 = arith.constant 0 : i32
    %c0_i32_1 = arith.constant 0 : i32
    return %c0_i32, %c0_i32_0 : i32, i32
  }
  func.func @transform_5(%arg0: i32, %arg1: i32) -> (i32, i32) {
    %c0_i32 = arith.constant 0 : i32
    %c0_i32_0 = arith.constant 0 : i32
    return %c0_i32, %arg1 : i32, i32
  }
  func.func @transform_6(%arg0: i32, %arg1: i32) -> (i32, i32) {
    %c0_i32 = arith.constant 0 : i32
    %c0_i32_0 = arith.constant 0 : i32
    return %c0_i32, %arg1 : i32, i32
  }
  func.func @transform_7(%arg0: i32, %arg1: i32) -> (i32, i32) {
    %c0_i32 = arith.constant 0 : i32
    return %arg0, %arg1 : i32, i32
  }
}

</mosaic_0001>

<bundles_post_ra>
// kernel: tpu_custom_call.1
= control target key start
LH: loop header
LB: loop body
LE: loop exit
PB: predicated region body
PF: predicated region fallthrough
CT: control target
= control target key end

     0   :  { %s1537_s0 = inlined_call_operand.hbm [shape: f32[16,32], index: 0, kind: input, shape index: {}]   ;;  %s1538_s1 = inlined_call_operand.hbm [shape: f32[32,32], index: 1, kind: input, shape index: {}]   ;;  %s1539_s2 = inlined_call_operand.vmem [shape: f32[1,32], index: 2, kind: input, shape index: {}]   ;;  %s1540_s3 = inlined_call_operand.vmem [shape: f32[1,32], index: 3, kind: input, shape index: {}]   ;;  %s1541_s4 = inlined_call_operand.vmem [shape: f32[1,32], index: 4, kind: input, shape index: {}]   ;;  %s1542_s5 = inlined_call_operand.hbm [shape: f32[32,384], index: 5, kind: input, shape index: {}]   ;;  %s1543_s6 = inlined_call_operand.vmem [shape: f32[1,384], index: 6, kind: input, shape index: {}]   ;;  %s1544_s7 = inlined_call_operand.hbm [shape: f32[16,384], index: 7, kind: output, shape index: {}]  }
   0x1   :  { %1571 = sst [smem:[#allocation24_spill]] %s1537_s0 }
   0x2   :  { %1572 = sst [smem:[#allocation25_spill]] %s1538_s1 }
   0x3   :  { %1573 = sst [smem:[#allocation26_spill]] %s1539_s2 }
   0x4   :  { %1574 = sst [smem:[#allocation27_spill]] %s1540_s3 }
   0x5   :  { %1575 = sst [smem:[#allocation28_spill]] %s1541_s4 }
   0x6   :  { %1576 = sst [smem:[#allocation29_spill]] %s1543_s6 }
   0x7   :  { %1577 = sst [smem:[#allocation30_spill]] %s1544_s7 }
   0x8   :  { %12 = vsyncpa [#allocation4], 0 }
   0x9   :  { %13 = vsyncpa [#allocation7], 0 }
   0xa   :  { %14 = vsyncpa [#allocation5], 0 }
   0xb   :  { %16 = vsyncpa [#allocation5 + $0x1], 0  ;;  %s1195_s24 = smov 0   ;;  %s1197_s25 = smov 0  }
   0xc   :  { %1578 = sst [smem:[#allocation14_spill]] %s1195_s24  ;;  %s1199_s26 = smov 0  }
   0xd   :  { %s1201_s27 = smov 0   ;;  %s1203_s28 = smov 0  }
   0xe   :  { %s1205_s29 = smov 0   ;;  %s1207_s30 = smov 0  }
   0xf   :  { %s1209_s8 = smov 0   ;;  %s1211_s9 = smov 0  }
  0x10   :  { %s1213_s10 = smov 0   ;;  %s1215_s11 = smov 0  }
  0x11   :  { %s1217_s12 = smov 0   ;;  %s1219_s13 = smov 0  }
  0x12   :  { %s1221_s14 = smov 0  }
  0x13 LB: > { %s1580_s24 = sld [smem:[#allocation14_spill]]  ;;  %s1262_s15 = sadd.s32 4294967295, %s1142_s14   ;;  %s1142_s14 = sphi %s1221_s14, %s22_s14   ;;  %s1138_s13 = sphi %s1219_s13, %s1648_s13   ;;  %s1134_s12 = sphi %s1217_s12, %s1636_s12   ;;  %s1130_s11 = sphi %s1215_s11, %s1647_s11   ;;  %s1126_s10 = sphi %s1213_s10, %s1646_s10   ;;  %s1122_s9 = sphi %s1211_s9, %s1645_s9   ;;  %s1118_s8 = sphi %s1209_s8, %s1644_s8   ;;  %s1114_s30 = sphi %s1207_s30, %s1634_s30   ;;  %s1110_s29 = sphi %s1205_s29, %s1643_s29   ;;  %s1106_s28 = sphi %s1203_s28, %s1642_s28   ;;  %s1102_s27 = sphi %s1201_s27, %s1641_s27   ;;  %s1098_s26 = sphi %s1199_s26, %s1640_s26   ;;  %s1094_s25 = sphi %s1197_s25, %s1639_s25  }
  0x14   : > { %1582 = sst [smem:[#allocation15_spill]] %s1094_s25  ;;  %s699_s16 = sadd.s32 4294967294, %s1142_s14  }
  0x15   : > { %1583 = sst [smem:[#allocation16_spill]] %s1118_s8  ;;  %p54_p0 = scmp.ne.s32.totalorder %s1118_s8, %s1114_s30 }
  0x16   : > { %1584 = sst [smem:[#allocation17_spill]] %s1126_s10  ;;  %p1548_p1 = scmp.eq.s32.totalorder %s1262_s15, 0 }
  0x17   : > { %1585 = sst [smem:[#allocation18_spill]] %s1130_s11  ;;  %p158_p2 = scmp.ne.s32.totalorder %s1110_s29, %s1106_s28 }
  0x18   : > { %1586 = sst [smem:[#allocation19_spill]] %s1134_s12  ;;  %p1272_p3 = por %p1548_p1, %p54_p0 }
  0x19   : > { %1581 = sst [smem:[#allocation14_spill]] %s1580_s24  ;;  %p159_p4 = scmp.eq.s32.totalorder %s1142_s14, 0 }
  0x1a   : > { %1587 = sst [smem:[#allocation20_spill]] %s1142_s14  ;;  %p164_p5 = scmp.ne.s32.totalorder %s1106_s28, %s1102_s27 }
  0x1b   : > { %s1588_s18 = scalar_select %p1272_p3, 1, 0 }
  0x1c   : > { %p1279_p6 = por %p159_p4, %p158_p2  ;;  %p215_p7 = scmp.ne.s32.totalorder %s1098_s26, %s1094_s25 }
  0x1d   : > { %p1287_p8 = por %p164_p5, %p1548_p1  ;;  %p216_p9 = scmp.eq.s32.totalorder %s1262_s15, 5 }
  0x1e   : > { %p221_p10 = scmp.ne.s32.totalorder %s1094_s25, %s1580_s24  ;;  %p222_p11 = scmp.eq.s32.totalorder %s699_s16, 5 }
  0x1f   : > { %s1590_s21 = scalar_select %p1287_p8, 1, 0 }
  0x20   : > { %p1294_p12 = por %p216_p9, %p215_p7  ;;  %p700_p13 = scmp.ge.s32.totalorder %s1142_s14, 1 }
  0x21   : > { %p1299_p0 = por %p222_p11, %p221_p10  ;;  %p229_p2 = scmp.lt.s32.totalorder %s1142_s14, 7 }
  0x22   : > { %s1591_s22 = scalar_select %p1294_p12, 1, 0 }
  0x23   : > { %s1593_s23 = scalar_select %p1299_p0, 1, 0 }
  0x24   : > { %1592 = sst [smem:[#allocation21_spill]] %s1591_s22  ;;  %s701_s27 = sshll.u32 %s1130_s11, 7 }
  0x25   : > { %1594 = sst [smem:[#allocation22_spill]] %s1593_s23  ;;  %p1305_p4 = pnand %p700_p13, %p229_p2 }
  0x26   : > { %s1596_s0 = sld [smem:[#allocation24_spill]]  ;;  %s1144_s8 = smov [#allocation3]  }
  0x27   : > { %s1595_s30 = scalar_select %p1305_p4, 1, 0 }
  0x28   : > { %s244_s24 = sshll.u32 %s1144_s8, 4  ;;  %p1553_p5 = pneg %p1305_p4  ;;  %s245_s24 = int_to_ptr.vmem [resolvable:$true] %s244_s24 }
  0x29   : > { %p780_p7 = scmp.lt.s32.totalorder %s1142_s14, 6  ;;  %s1145_s19 = smov [#allocation6]  }
  0x2a   : > { %p1322_p9 = pnand %p1553_p5, %p1272_p3 }
  0x2b   : > { %p1328_p10 = pnand %p780_p7, %p1279_p6 }
  0x2c   : > { %s1312_s16 = scalar_lea.hbm %s1596_s0, %s701_s27  ;;  %s254_s27 = sshll.u32 %s1145_s19, 4  ;;  %s1332_s27 = int_to_ptr.vmem [resolvable:$true] %s254_s27 }
  0x2d   : > { %s1598_s17 = scalar_select %p1328_p10, 1, 0 }
  0x2e   : > { %s908_s8 = scalar_lea.hbm %s1312_s16, 128  ;;  %p910_p13 = pneg %p1322_p9 }
  0x2f   : > { %p909_p11 = scmp.ne.s32.totalorder %s1312_s16, %s908_s8  ;;  %s913_s11 = scalar_lea.hbm %s1596_s0, 256 }
  0x30   : > { %p914_p6 = scmp.lt.s32.totalorder %s1312_s16, %s1596_s0  ;;  %p915_p7 = scmp.lt.s32.totalorder %s913_s11, %s908_s8 }
  0x31   : > { %p911_p2 = pnand %p910_p13, %p909_p11 }
  0x32   : > { %p916_p5 = por %p915_p7, %p914_p6 }
  0x33   : > { %p912_p1 = pneg %p911_p2 }
  0x35   : > { %p917_p0 = pnand %p916_p5, %p912_p1 }
  0x37   : > { %920 = shalt.err (!%p917_p0)
}
  0x38   : > { %s921_s19 = scalar_lea.vmem %s245_s24, 128  ;;  %p929_p10 = scmp.lt.s32.totalorder %s245_s24, %s245_s24 }
  0x39   : > { %p922_p12 = scmp.ne.s32.totalorder %s245_s24, %s921_s19  ;;  %p930_p4 = scmp.lt.s32.totalorder %s921_s19, %s921_s19 }
  0x3b   : > { %p924_p8 = pnand %p922_p12, %p910_p13  ;;  %p931_p11 = por %p930_p4, %p929_p10 }
  0x3d   : > { %p925_p3 = pneg %p924_p8 }
  0x3f   : > { %p932_p2 = pnand %p931_p11, %p925_p3 }
  0x41   : > { %935 = shalt.err (!%p932_p2)
}
  0x42   : > { %767 = dma.hbm_to_vmem [thread:$0]  (!%p1322_p9), %s1312_s16, 128, %s245_s24, [#allocation4]  }
  0x43   : > { %p1599_p1 = scmp.eq.s32.totalorder %s1262_s15, 0  ;;  %p1600_p0 = scmp.ne.s32.totalorder %s1595_s30, 0 }
  0x44   : > { %s947_s4 = scalar_lea.vmem %s1332_s27, 512  ;;  %p955_p3 = scmp.lt.s32.totalorder %s1332_s27, %s1332_s27 }
  0x45   : > { %p1601_p5 = pneg %p1600_p0  ;;  %p948_p8 = scmp.ne.s32.totalorder %s1332_s27, %s947_s4 }
  0x46   : > { %p956_p10 = scmp.lt.s32.totalorder %s947_s4, %s947_s4 }
  0x47   : > { %p768_p6 = pnand %p1601_p5, %p1599_p1 }
  0x48   : > { %p957_p7 = por %p956_p10, %p955_p3 }
  0x49   : > { %p938_p12 = pneg %p768_p6 }
  0x4b   : > { %p950_p13 = pnand %p948_p8, %p938_p12 }
  0x4d   : > { %p951_p4 = pneg %p950_p13 }
  0x4f   : > { %p958_p11 = pnand %p957_p7, %p951_p4 }
  0x51   : > { %961 = shalt.err (!%p958_p11)
}
  0x52   : > { %s1561_s7 = smov 128   ;;  %s1562_s24 = smov 8  }
  0x53   : > { %s1602_s1 = sld [smem:[#allocation25_spill]]  ;;  %s31_s23 = sadd.s32 1, %s1134_s12 }
  0x54   : > { %p32_p9 = scmp.ge.s32.totalorder %s31_s23, 3  ;;  %s34_s16 = sadd.s32 1, %s1138_s13 }
  0x55   : > { %s41_s8 = sadd.s32 1, %s1122_s9  ;;  %s277_s20 = sand.u32 1, %s1142_s14  }
  0x56   : > { %s1650_s23 = smov (%p32_p9, %s31_s23), 0  ;;  %s1652_s16 = smov (!%p32_p9, %s34_s16), %s1138_s13 }
  0x57   : > { %1603 = sst [smem:[#allocation23_spill]] %s1650_s23  ;;  %s148_s19 = ssub.s32 %s1134_s12, %s1650_s23 }
  0x58   : > { %p36_p2 = scmp.ge.s32.totalorder %s1652_s16, 2  ;;  %p149_p1 = scmp.eq.s32.totalorder %s148_s19, 0 }
  0x59   : > { %770 = dma.hbm_to_vmem [thread:$0]  (!%p768_p6), %s1602_s1, 512, %s1332_s27, [#allocation7], %s1561_s7, %s1561_s7, %s1562_s24  }
  0x5a   : > { %s279_s4 = sand.u32 1, %s1110_s29   ;;  %s705_s11 = sshll.u32 %s1134_s12, 7 }
  0x5b   : > { %s1654_s16 = smov (%p36_p2, %s1652_s16), 0  ;;  %s1604_s27 = sadd.s32 1, %s1110_s29 }
  0x5c   : > { %s1380_s22 = scalar_select %p149_p1, %s1110_s29, %s1604_s27  }
  0x5d   : > { %s38_s7 = ssub.s32 %s1138_s13, %s1654_s16  ;;  %s704_s24 = sshll.u32 %s279_s4, 5 }
  0x5e   : > { %p39_p5 = scmp.eq.s32.totalorder %s38_s7, 0  ;;  %s202_s0 = sor.u32 %s148_s19, %s38_s7 }
  0x5f   : > { %p203_p6 = scmp.eq.s32.totalorder %s202_s0, 0  ;;  %s1605_s14 = sadd.s32 1, %s1098_s26 }
  0x60   : > { %s1385_s1 = scalar_select %p39_p5, %s1122_s9, %s41_s8  }
  0x61   : > { %s1390_s23 = scalar_select %p203_p6, %s1098_s26, %s1605_s14  }
  0x62   : > { %s286_s12 = scalar_lea.hbm %s1542_s5, %s705_s11  ;;  %s281_s6 = scalar_lea.vmem [#allocation8], %s704_s24 }
  0x63   : > { %s287_s10 = sshll.u32 %s281_s6, 4  ;;  %s278_s25 = scalar_lea.sflag [#allocation4], %s277_s20  ;;  %s288_s10 = int_to_ptr.vmem [resolvable:$true] %s287_s10 }
  0x64   : > { %p1606_p12 = scmp.ne.s32.totalorder %s1598_s17, 0  ;;  %s975_s27 = scalar_lea.vmem %s288_s10, 512 }
  0x65   : > { %p976_p13 = scmp.ne.s32.totalorder %s288_s10, %s975_s27  ;;  %s1148_s0 = smov [#allocation8]  }
  0x66   : > { %p964_p8 = pneg %p1606_p12  ;;  %s980_s7 = sshll.u32 %s1148_s0, 4  ;;  %s981_s7 = int_to_ptr.vmem [resolvable:$false] %s980_s7 }
  0x67   : > { %s982_s8 = scalar_lea.vmem %s981_s7, 1024  ;;  %p983_p10 = scmp.lt.s32.totalorder %s288_s10, %s981_s7 }
  0x68   : > { %p978_p4 = pnand %p976_p13, %p964_p8  ;;  %p984_p7 = scmp.lt.s32.totalorder %s982_s8, %s975_s27 }
  0x6a   : > { %p979_p3 = pneg %p978_p4  ;;  %p985_p11 = por %p984_p7, %p983_p10 }
  0x6c   : > { %p986_p9 = pnand %p985_p11, %p979_p3 }
  0x6e   : > { %989 = shalt.err (!%p986_p9)
}
  0x6f   : > { %s1149_s2 = smov 384   ;;  %s1607_s3 = smov 8  }
  0x70   : > { %s1608_s6 = smov 128   ;;  %305 = sbr.rel (%p1600_p0) target bundleno = 891 (0x37b), region = 48 }
  0x71   : > { %774 = dma.hbm_to_vmem [thread:$0]  (!%p1606_p12), %s286_s12, 512, %s288_s10, %s278_s25, %s1149_s2, %s1608_s6, %s1607_s3  }
  0x72   : > { %p1609_p2 = scmp.ne.s32.totalorder (!%p1600_p0), %s1588_s18, 0 }
  0x75   : > { %1073 = dma.done.wait (%p1609_p2), [#allocation4], 128  }
  0x76   : > { %1075 = vsyncadd (%p1609_p2), [#allocation4], 4294967168  ;;  %p1610_p1 = scmp.eq.s32.totalorder %s1262_s15, 0 }
  0x78   : > { %1077 = dma.done.wait (%p1610_p1), [#allocation7], 512   ;;  %p1611_p5 = pmov %p1610_p1 }
  0x79   : > { %s315_s14 = sand.u32 1, %s1262_s15   ;;  %s317_s25 = sand.u32 1, %s1106_s28  }
  0x7a   : > { %1079 = vsyncadd (%p1611_p5), [#allocation7], 4294966784  ;;  %s708_s10 = sshll.u32 %s317_s25, 5  ;;  %s316_s12 = scalar_lea.sflag [#allocation4], %s315_s14 }
  0x7b   : > { %s1413_s30 = scalar_lea.vmem [#allocation8], %s708_s10  ;;  %p1612_p0 = scmp.ne.s32.totalorder %s1590_s21, 0 }
  0x7d   : > { %1081 = dma.done.wait (%p1612_p0), %s316_s12, 512  }
  0x7e   : > { %1083 = vsyncadd (%p1612_p0), %s316_s12, 4294966784  ;;  %s1613_s18 = sld [smem:[#allocation15_spill]] }
  0x7f   : > { %s1614_s17 = sld [smem:[#allocation17_spill]] }
  0x80   : > { %s1615_s11 = sld [smem:[#allocation29_spill]] }
  0x84   : > { %s1570_s24 = sand.u32 1, %s1613_s18  }
  0x85   : > { %p353_p6 = scmp.lt.s32.totalorder %s1614_s17, 2  ;;  %s1423_s20 = sshll.u32 %s1570_s24, 3 }
  0x86   : > { %s352_s0 = scalar_lea.vmem [#allocation9], %s1423_s20  ;;  %p710_p12 = scmp.ne.s32.totalorder %s1614_s17, 0 }
  0x87   : > { %s1426_s15 = scalar_select %p353_p6, %s1614_s17, 2 }
  0x88   : > { %359 = sbr.rel (%p710_p12) target bundleno = 674 (0x2a2), region = 64  ;;  %s1616_s8 = sld [smem:[#allocation26_spill]] (!%p710_p12) }
  0x89   : > { %s355_s27 = scalar_lea.vmem %s1615_s11, %s1426_s15  ;;  %s1617_s6 = sld [smem:[#allocation27_spill]] (!%p710_p12) }
  0x8a   : > { %s1618_s10 = sld [smem:[#allocation28_spill]] (!%p710_p12) }
  0x8d   : > { %v364_v0 = vld [vmem:[#allocation6 + $0x18] sm:$0xff]  ;;  %v1150_v1 = vmov 0.0   ;;  %v363_v2 = vld [vmem:[#allocation6 + $0x10] sm:$0xff]  ;;  %vm1151_vm0 = vmmov 0   ;;  %v362_v3 = vld [vmem:[#allocation6 + $0x8] sm:$0xff]  ;;  %vm372_vm1 = vcmask 261120  }
  0x8e   : > { %731 = vmatprep.subr.mxu0 %v1150_v1  ;;  %739 = vmatprep.mubr.msk.f32.mxu0 %vm1151_vm0, %v1150_v1  ;;  %v361_v4 = vld [vmem:[#allocation6] sm:$0xff]  ;;  %v360_v5 = vld [vmem:[#allocation3] sm:$0xff]  ;;  %v711_v6 = vld [vmem:[%s1616_s8] ss:$0 sm:$0xff] }
  0x8f   : > { %732 = vmatpush3.msra.mxu0 %v364_v0  ;;  %v713_v25 = vld [vmem:[%s1617_s6] ss:$0 sm:$0xff] }
  0x90   : > { %733 = vmatprep.subr.mxu0 %v1150_v1  ;;  %v714_v27 = vld [vmem:[%s1618_s10] ss:$0 sm:$0xff] }
  0x91   : > { %734 = vmatpush3.msra.mxu0 %v363_v2 }
  0x92   : > { %735 = vmatprep.subr.mxu0 %v1150_v1 }
  0x93   : > { %736 = vmatpush3.msra.mxu0 %v362_v3 }
  0x94   : > { %737 = vmatprep.subr.mxu0 %v1150_v1 }
  0x95   : > { %738 = vmatpush3.msra.mxu0 %v361_v4 }
  0x96   : > { %740 = vmatmul.mubr.msk.f32.vlgmr.msra.gmra.mxu0 %vm372_vm1, %v360_v5 }
 0x156   : > { %v442_v7 = vpop.f32.mrf.mxu0 }
 0x157   : > { %v443_v8 = vadd.f32 %v711_v6, %v442_v7 }
 0x158   : > { %v741_v9 = vpop.f32.mrf.mxu0 }
 0x159   : > { %v447_v10 = vmul.f32 0.70710677, %v443_v8  ;;  %v446_v12 = vmul.f32 0.5, %v443_v8 }
 0x15b   : > { %904 = verf.f32 %v447_v10 }
 0x168   : > { %v905_v11 = vpop.eup %904 }
 0x169   : > { %v449_v13 = vadd.f32 1.0, %v905_v11 }
 0x16b   : > { %v450_v14 = vmul.f32 %v449_v13, %v446_v12 }
 0x16d   : > { %v451_v15 = vsel %vm372_vm1, %v450_v14, 0.0 }
 0x16e   : > { %452 = vadd.xlane.f32.xlu0 %v451_v15 }
 0x1f7   : > { %v453_v16 = vpop.xlane.xlu0 %452 }
 0x1f8   : > { %v455_v17 = vmul.f32 0.03125, %v453_v16 }
 0x1fa   : > { %v456_v18 = vsub.f32 %v450_v14, %v455_v17 }
 0x1fc   : > { %v457_v19 = vmul.f32 %v456_v18, %v456_v18 }
 0x1fe   : > { %v458_v20 = vsel %vm372_vm1, %v457_v19, 0.0 }
 0x1ff   : > { %459 = vadd.xlane.f32.xlu0 %v458_v20 }
 0x288   : > { %v460_v21 = vpop.xlane.xlu0 %459 }
 0x289   : > { %v461_v22 = vmul.f32 0.03125, %v460_v21 }
 0x28b   : > { %v462_v23 = vadd.f32 1e-05, %v461_v22 }
 0x28d   : > { %906 = vrsqrt.f32 %v462_v23 }
 0x29a   : > { %v907_v24 = vpop.eup %906 }
 0x29b   : > { %v464_v26 = vmul.f32 %v907_v24, %v456_v18 }
 0x29d   : > { %v472_v28 = vmul.f32 %v713_v25, %v464_v26 }
 0x29f   : > { %v480_v29 = vadd.f32 %v714_v27, %v472_v28 }
 0x2a1   : > { %481 = vst.msk [vmem:[#allocation2] sm:$0xff] %vm372_vm1, %v480_v29 }
 0x2a2 PF: > { %v486_v30 = vld [vmem:[%s1413_s30 + $0x18] sm:$0xff]  ;;  %v1152_v31 = vmov 0.0   ;;  %s1619_s12 = sld [smem:[#allocation18_spill]]  ;;  %v485_v32 = vld [vmem:[%s1413_s30 + $0x10] sm:$0xff]  ;;  %vm1153_vm2 = vmmov 0   ;;  %v484_v33 = vld [vmem:[%s1413_s30 + $0x8] sm:$0xff] }
 0x2a3   : > { %742 = vmatprep.subr.mxu0 %v1152_v31  ;;  %s1620_s18 = sld [smem:[#allocation17_spill]]  ;;  %750 = vmatprep.mubr.msk.f32.mxu0 %vm1153_vm2, %v1152_v31  ;;  %v483_v34 = vld [vmem:[%s1413_s30] sm:$0xff]  ;;  %vm494_vm3 = vcmask 261120   ;;  %v715_v36 = vld [vmem:[%s355_s27] ss:$0 sm:$0xff]  ;;  %s585_s3 = sshll.u32 %s352_s0, 4  ;;  %s586_s3 = int_to_ptr.vmem [resolvable:$true] %s585_s3 }
 0x2a4   : > { %743 = vmatpush3.msra.mxu0 %v486_v30  ;;  %s1621_s17 = sld [smem:[#allocation15_spill]]  ;;  %s1154_s15 = smov [#allocation9]  }
 0x2a5   : > { %744 = vmatprep.subr.mxu0 %v1152_v31  ;;  %s1622_s19 = sld [smem:[#allocation21_spill]]  ;;  %s994_s27 = sshll.u32 %s1154_s15, 4  ;;  %s995_s27 = int_to_ptr.vmem [resolvable:$false] %s994_s27 }
 0x2a6   : > { %745 = vmatpush3.msra.mxu0 %v485_v32  ;;  %s1624_s14 = sld [smem:[#allocation30_spill]]  ;;  %p997_p10 = scmp.lt.s32.totalorder %s586_s3, %s995_s27 }
 0x2a7   : > { %746 = vmatprep.subr.mxu0 %v1152_v31 }
 0x2a8   : > { %747 = vmatpush3.msra.mxu0 %v484_v33  ;;  %v482_v35 = vld [vmem:[#allocation2] sm:$0xff]  ;;  %s753_s4 = smul.u32 3, %s1619_s12 }
 0x2a9   : > { %748 = vmatprep.subr.mxu0 %v1152_v31 }
 0x2aa   : > { %749 = vmatpush3.msra.mxu0 %v483_v34  ;;  %s581_s11 = sadd.s32 %s1620_s18, %s753_s4  ;;  %s1626_s10 = sand.u32 1, %s1621_s17  }
 0x2ab   : > { %751 = vmatmul.mubr.msk.f32.vlgmr.msra.gmra.mxu0 %vm494_vm3, %v482_v35  ;;  %s718_s2 = sshll.u32 %s581_s11, 7  ;;  %s570_s12 = scalar_lea.sflag [#allocation5], %s1626_s10 }
 0x2ac   : > { %s1625_s24 = smov %s1624_s14  ;;  %s1463_s25 = scalar_lea.hbm %s1624_s14, %s718_s2 }
 0x2ad   : > { %s990_s18 = scalar_lea.vmem %s586_s3, 128  ;;  %p1627_p13 = scmp.ne.s32.totalorder %s1622_s19, 0 }
 0x2ae   : > { %p991_p8 = scmp.ne.s32.totalorder %s586_s3, %s990_s18  ;;  %s996_s4 = scalar_lea.vmem %s995_s27, 256 }
 0x2af   : > { %p998_p7 = scmp.lt.s32.totalorder %s996_s4, %s990_s18 }
 0x2b0   : > { %p992_p4 = pnand %p991_p8, %p1627_p13 }
 0x2b1   : > { %p999_p11 = por %p998_p7, %p997_p10 }
 0x2b2   : > { %p993_p3 = pneg %p992_p4 }
 0x2b4   : > { %p1000_p9 = pnand %p999_p11, %p993_p3 }
 0x36b   : > { %v564_v37 = vpop.f32.mrf.mxu0 }
 0x36c   : > { %v565_v38 = vadd.f32 %v715_v36, %v564_v37 }
 0x36d   : > { %v752_v39 = vpop.f32.mrf.mxu0 }
 0x36e   : > { %568 = vst [vmem:[%s352_s0] sm:$0xff] %v565_v38 }
 0x36f   : > { %1003 = shalt.err (!%p1000_p9)
}
 0x370   : > { %s1004_s20 = scalar_lea.hbm %s1463_s25, 128  ;;  %s1008_s11 = scalar_lea.hbm %s1625_s24, 768 }
 0x371   : > { %p1005_p2 = scmp.ne.s32.totalorder %s1463_s25, %s1004_s20  ;;  %p1009_p0 = scmp.lt.s32.totalorder %s1463_s25, %s1625_s24 }
 0x372   : > { %p1010_p6 = scmp.lt.s32.totalorder %s1008_s11, %s1004_s20 }
 0x373   : > { %p1006_p1 = pnand %p1005_p2, %p1627_p13 }
 0x374   : > { %p1011_p12 = por %p1010_p6, %p1009_p0 }
 0x375   : > { %p1007_p5 = pneg %p1006_p1 }
 0x377   : > { %p1012_p8 = pnand %p1011_p12, %p1007_p5 }
 0x379   : > { %1015 = shalt.err (!%p1012_p8)
}
 0x37a   : > { %762 = dma.vmem_to_hbm [thread:$0]  (%p1627_p13), %s586_s3, 128, %s1463_s25, %s570_s12  }
 0x37b PF: > { %s1628_s8 = sld [smem:[#allocation20_spill]] }
 0x37c   : > { %s1629_s2 = sld [smem:[#allocation14_spill]] }
 0x37d   : > { %s1630_s30 = sld [smem:[#allocation22_spill]] }
 0x381   : > { %p782_p4 = scmp.ge.s32.totalorder %s1628_s8, 2 }
 0x382   : > { %s597_s6 = sand.u32 1, %s1629_s2  }
 0x383   : > { %p1631_p3 = scmp.ne.s32.totalorder %s1630_s30, 0  ;;  %s598_s14 = scalar_lea.sflag [#allocation5], %s597_s6 }
 0x385   : > { %p776_p10 = pnand %p782_p4, %p1631_p3 }
 0x387   : > { %p777_p7 = pneg %p776_p10 }
 0x389   : > { %1085 = dma.done.wait (%p777_p7), %s598_s14, 128  }
 0x38a   : > { %1087 = vsyncadd (%p777_p7), %s598_s14, 4294967168  ;;  %s22_s14 = sadd.s32 1, %s1628_s8   ;;  %s1633_s19 = sld [smem:[#allocation15_spill]] }
 0x38b   : > { %p1490_p11 = scmp.ge.s32.totalorder %s22_s14, 8   ;;  %s1634_s30 = sld [smem:[#allocation16_spill]] }
 0x38c   : > { %s1635_s3 = sld [smem:[#allocation19_spill]]  ;;  %s1639_s25 = smov %s1098_s26 }
 0x38d   : > { %s1636_s12 = sld [smem:[#allocation23_spill]]  ;;  %s1640_s26 = smov %s1390_s23 }
 0x38e   : > { %s1641_s27 = smov %s1106_s28  ;;  %s1642_s28 = smov %s1110_s29 }
 0x38f   : > { %s1643_s29 = smov %s1380_s22  ;;  %s1644_s8 = smov %s1122_s9 }
 0x390   : > { %1638 = sst [smem:[#allocation14_spill]] %s1633_s19  ;;  %s1645_s9 = smov %s1385_s1 }
 0x391   : > { %s1647_s11 = smov %s1138_s13  ;;  %s1648_s13 = smov %s1654_s16 }
 0x392   : > { %s1646_s10 = smov %s1635_s3  ;;  %21 = sbr.rel (!%p1490_p11) target bundleno = 19 (0x13), region = 108 }
 0x397   :  { %603 = vsyncpa [#allocation4], 1 }
 0x398   :  { %605 = vsyncpa [#allocation4 + $0x1], 1 }
 0x399   :  { %606 = vsyncpa [#allocation7], 1 }
 0x39a   :  { %607 = vsyncpa [#allocation5], 1 }
 0x39b   :  { %609 = vsyncpa [#allocation5 + $0x1], 1 }

// kernel: tpu_custom_call.1
= control target key start
LH: loop header
LB: loop body
LE: loop exit
PB: predicated region body
PF: predicated region fallthrough
CT: control target
= control target key end

     0   :  { %s1574_s0 = inlined_call_operand.hbm [shape: f32[16,32], index: 0, kind: input, shape index: {}]   ;;  %s1575_s1 = inlined_call_operand.hbm [shape: f32[32,32], index: 1, kind: input, shape index: {}]   ;;  %s1576_s2 = inlined_call_operand.vmem [shape: f32[1,32], index: 2, kind: input, shape index: {}]   ;;  %s1577_s3 = inlined_call_operand.vmem [shape: f32[1,32], index: 3, kind: input, shape index: {}]   ;;  %s1578_s4 = inlined_call_operand.vmem [shape: f32[1,32], index: 4, kind: input, shape index: {}]   ;;  %s1579_s5 = inlined_call_operand.hbm [shape: f32[32,384], index: 5, kind: input, shape index: {}]   ;;  %s1580_s6 = inlined_call_operand.vmem [shape: f32[1,384], index: 6, kind: input, shape index: {}]   ;;  %s1581_s7 = inlined_call_operand.hbm [shape: f32[16,384], index: 7, kind: output, shape index: {}]  }
   0x1   :  { %1590 = sst [smem:[#allocation21_spill]] %s1574_s0 }
   0x2   :  { %1591 = sst [smem:[#allocation22_spill]] %s1575_s1 }
   0x3   :  { %1592 = sst [smem:[#allocation23_spill]] %s1576_s2 }
   0x4   :  { %1593 = sst [smem:[#allocation24_spill]] %s1577_s3 }
   0x5   :  { %1594 = sst [smem:[#allocation25_spill]] %s1578_s4 }
   0x6   :  { %1595 = sst [smem:[#allocation26_spill]] %s1579_s5 }
   0x7   :  { %1596 = sst [smem:[#allocation27_spill]] %s1580_s6 }
   0x8   :  { %1597 = sst [smem:[#allocation28_spill]] %s1581_s7 }
   0x9   :  { %12 = vsyncpa [#allocation4], 0 }
   0xa   :  { %14 = vsyncpa [#allocation4 + $0x1], 0 }
   0xb   :  { %15 = vsyncpa [#allocation7], 0 }
   0xc   :  { %16 = vsyncpa [#allocation5], 0 }
   0xd   :  { %18 = vsyncpa [#allocation5 + $0x1], 0  ;;  %s1222_s24 = smov 0   ;;  %s1224_s25 = smov 0  }
   0xe   :  { %s1226_s26 = smov 0   ;;  %s1228_s27 = smov 0  }
   0xf   :  { %s1230_s28 = smov 0   ;;  %s1232_s29 = smov 0  }
  0x10   :  { %s1234_s30 = smov 0   ;;  %s1236_s8 = smov 0  }
  0x11   :  { %s1238_s9 = smov 0   ;;  %s1240_s10 = smov 0  }
  0x12   :  { %s1242_s11 = smov 0   ;;  %s1244_s12 = smov 0  }
  0x13   :  { %s1246_s13 = smov 0   ;;  %s1248_s14 = smov 0  }
  0x14 LB: > { %1598 = sst [smem:[#allocation14_spill]] %s1153_s10  ;;  %s33_s15 = sadd.s32 1, %s1161_s12  ;;  %s1169_s14 = sphi %s1248_s14, %s24_s14   ;;  %s1165_s13 = sphi %s1246_s13, %s1636_s13   ;;  %s1161_s12 = sphi %s1244_s12, %s1635_s12   ;;  %s1157_s11 = sphi %s1242_s11, %s1634_s11   ;;  %s1153_s10 = sphi %s1240_s10, %s1646_s10   ;;  %s1149_s9 = sphi %s1238_s9, %s1645_s9   ;;  %s1145_s8 = sphi %s1236_s8, %s1644_s8   ;;  %s1141_s30 = sphi %s1234_s30, %s1643_s30   ;;  %s1137_s29 = sphi %s1232_s29, %s1642_s29   ;;  %s1133_s28 = sphi %s1230_s28, %s1641_s28   ;;  %s1129_s27 = sphi %s1228_s27, %s1640_s27   ;;  %s1125_s26 = sphi %s1226_s26, %s1639_s26   ;;  %s1121_s25 = sphi %s1224_s25, %s1638_s25   ;;  %s1117_s24 = sphi %s1222_s24, %s1637_s24  }
  0x15   : > { %1599 = sst [smem:[#allocation15_spill]] %s1157_s11  ;;  %s36_s16 = sadd.s32 1, %s1165_s13 }
  0x16   : > { %1600 = sst [smem:[#allocation16_spill]] %s1161_s12  ;;  %p34_p0 = scmp.ge.s32.totalorder %s33_s15, 3 }
  0x17   : > { %1601 = sst [smem:[#allocation17_spill]] %s1165_s13  ;;  %s43_s17 = sadd.s32 1, %s1149_s9 }
  0x18   : > { %p50_p1 = scmp.ne.s32.totalorder %s1149_s9, %s1145_s8  ;;  %p51_p2 = scmp.eq.s32.totalorder %s1169_s14, 0 }
  0x19   : > { %s1648_s15 = smov (%p34_p0, %s33_s15), 0  ;;  %s1650_s16 = smov (!%p34_p0, %s36_s16), %s1165_s13 }
  0x1a   : > { %1602 = sst [smem:[#allocation18_spill]] %s1648_s15  ;;  %p1303_p3 = por %p51_p2, %p50_p1 }
  0x1b   : > { %p56_p4 = scmp.ne.s32.totalorder %s1145_s8, %s1141_s30  ;;  %p38_p5 = scmp.ge.s32.totalorder %s1650_s16, 2 }
  0x1c   : > { %s150_s19 = ssub.s32 %s1161_s12, %s1648_s15  ;;  %s153_s20 = sadd.s32 1, %s1137_s29 }
  0x1d   : > { %p151_p6 = scmp.eq.s32.totalorder %s150_s19, 0  ;;  %s1652_s16 = smov (%p38_p5, %s1650_s16), 0 }
  0x1e   : > { %1604 = sst [smem:[#allocation19_spill]] %s1652_s16  ;;  %s40_s22 = ssub.s32 %s1165_s13, %s1652_s16 }
  0x1f   : > { %s1315_s21 = scalar_select %p151_p6, %s1137_s29, %s153_s20  }
  0x20   : > { %p160_p7 = scmp.ne.s32.totalorder %s1137_s29, %s1133_s28  ;;  %p41_p8 = scmp.eq.s32.totalorder %s40_s22, 0 }
  0x21   : > { %1605 = sst [smem:[#allocation20_spill]] %s1315_s21  ;;  %p166_p9 = scmp.ne.s32.totalorder %s1133_s28, %s1129_s27 }
  0x22   : > { %p1325_p10 = por %p160_p7, %p51_p2  ;;  %s204_s15 = sor.u32 %s150_s19, %s40_s22 }
  0x23   : > { %s1330_s7 = scalar_select %p41_p8, %s1149_s9, %s43_s17  }
  0x24   : > { %p205_p11 = scmp.eq.s32.totalorder %s204_s15, 0  ;;  %s207_s11 = sadd.s32 1, %s1125_s26 }
  0x25   : > { %p808_p12 = scmp.lt.s32.totalorder %s1169_s14, 6  ;;  %s266_s20 = sand.u32 1, %s1169_s14  }
  0x26   : > { %s1335_s4 = scalar_select %p205_p11, %s1125_s26, %s207_s11  }
  0x27   : > { %s268_s16 = sand.u32 1, %s1149_s9   ;;  %s730_s3 = sshll.u32 %s1165_s13, 7 }
  0x28   : > { %s729_s21 = sshll.u32 %s268_s16, 3  ;;  %s1607_s0 = sld [smem:[#allocation21_spill]] }
  0x29   : > { %s270_s1 = scalar_lea.vmem [#allocation3], %s729_s21  ;;  %p1345_p13 = pnand %p808_p12, %p1303_p3 }
  0x2a   : > { %s277_s5 = sshll.u32 %s270_s1, 4  ;;  %p1351_p0 = pnand %p808_p12, %p1325_p10  ;;  %s278_s5 = int_to_ptr.vmem [resolvable:$true] %s277_s5 }
  0x2b   : > { %s1355_s15 = scalar_lea.sflag [#allocation4], %s266_s20  ;;  %p937_p1 = pneg %p1345_p13 }
  0x2c   : > { %s948_s2 = scalar_lea.vmem %s278_s5, 128  ;;  %s1171_s1 = smov [#allocation3]  }
  0x2d   : > { %p949_p2 = scmp.ne.s32.totalorder %s278_s5, %s948_s2 }
  0x2e   : > { %s275_s10 = scalar_lea.hbm %s1607_s0, %s730_s3  ;;  %s953_s3 = sshll.u32 %s1171_s1, 4  ;;  %s954_s3 = int_to_ptr.vmem [resolvable:$false] %s953_s3 }
  0x2f   : > { %p951_p5 = pnand %p949_p2, %p937_p1  ;;  %s955_s6 = scalar_lea.vmem %s954_s3, 256 }
  0x30   : > { %p956_p3 = scmp.lt.s32.totalorder %s278_s5, %s954_s3  ;;  %p957_p7 = scmp.lt.s32.totalorder %s955_s6, %s948_s2 }
  0x31   : > { %p952_p6 = pneg %p951_p5 }
  0x32   : > { %p958_p8 = por %p957_p7, %p956_p3 }
  0x34   : > { %p959_p11 = pnand %p958_p8, %p952_p6 }
  0x36   : > { %962 = shalt.err (!%p959_p11)
}
  0x37   : > { %799 = dma.hbm_to_vmem [thread:$0]  (!%p1345_p13), %s275_s10, 128, %s278_s5, %s1355_s15  }
  0x38   : > { %s1363_s16 = sadd.s32 4294967295, %s1169_s14   ;;  %s725_s18 = sadd.s32 4294967294, %s1169_s14  }
  0x39   : > { %p1587_p10 = scmp.eq.s32.totalorder %s1363_s16, 0  ;;  %p217_p12 = scmp.ne.s32.totalorder %s1125_s26, %s1121_s25 }
  0x3a   : > { %p218_p1 = scmp.eq.s32.totalorder %s1363_s16, 5  ;;  %p223_p6 = scmp.ne.s32.totalorder %s1121_s25, %s1117_s24 }
  0x3b   : > { %p1375_p2 = por %p1587_p10, %p56_p4  ;;  %p1384_p13 = por %p166_p9, %p1587_p10 }
  0x3c   : > { %p1388_p5 = por %p218_p1, %p217_p12  ;;  %p224_p3 = scmp.eq.s32.totalorder %s725_s18, 5 }
  0x3d   : > { %p726_p7 = scmp.ge.s32.totalorder %s1169_s14, 1  ;;  %p231_p8 = scmp.lt.s32.totalorder %s1169_s14, 7 }
  0x3e   : > { %s1612_s10 = scalar_select %p1388_p5, 1, 0 }
  0x3f   : > { %p1396_p11 = por %p224_p3, %p223_p6  ;;  %p1400_p4 = pnand %p726_p7, %p231_p8 }
  0x40   : > { %s1172_s27 = smov [#allocation6]   ;;  %s286_s23 = sand.u32 1, %s1137_s29  }
  0x41   : > { %s1613_s30 = scalar_select %p1396_p11, 1, 0 }
  0x42   : > { %s243_s22 = sshll.u32 %s1172_s27, 4  ;;  %p792_p9 = pneg %p1400_p4  ;;  %s244_s22 = int_to_ptr.vmem [resolvable:$true] %s243_s22 }
  0x43   : > { %s732_s20 = sshll.u32 %s1161_s12, 7  ;;  %s731_s2 = sshll.u32 %s286_s23, 5 }
  0x44   : > { %p1410_p12 = pnand %p792_p9, %p1587_p10  ;;  %s1616_s6 = sld [smem:[#allocation26_spill]] }
  0x45   : > { %s288_s0 = scalar_lea.vmem [#allocation8], %s731_s2  ;;  %s974_s27 = scalar_lea.vmem %s244_s22, 512 }
  0x46   : > { %s294_s13 = sshll.u32 %s288_s0, 4  ;;  %p965_p1 = pneg %p1410_p12  ;;  %s295_s13 = int_to_ptr.vmem [resolvable:$true] %s294_s13 }
  0x47   : > { %p975_p6 = scmp.ne.s32.totalorder %s244_s22, %s974_s27  ;;  %p982_p8 = scmp.lt.s32.totalorder %s244_s22, %s244_s22 }
  0x48   : > { %p983_p9 = scmp.lt.s32.totalorder %s974_s27, %s974_s27 }
  0x49   : > { %p977_p3 = pnand %p975_p6, %p965_p1 }
  0x4a   : > { %s1417_s18 = scalar_lea.hbm %s1616_s6, %s732_s20  ;;  %p984_p10 = por %p983_p9, %p982_p8 }
  0x4b   : > { %p978_p7 = pneg %p977_p3 }
  0x4d   : > { %p985_p11 = pnand %p984_p10, %p978_p7 }
  0x4f   : > { %988 = shalt.err (!%p985_p11)
}
  0x50   : > { %s1173_s12 = smov 128   ;;  %s1174_s23 = smov 8  }
  0x51   : > { %s1617_s2 = sld [smem:[#allocation22_spill]]  ;;  %p991_p5 = pneg %p1351_p0 }
  0x52   : > { %s1002_s0 = scalar_lea.vmem %s295_s13, 512  ;;  %s1175_s3 = smov [#allocation8]  }
  0x53   : > { %p1003_p1 = scmp.ne.s32.totalorder %s295_s13, %s1002_s0  ;;  %s1007_s6 = sshll.u32 %s1175_s3, 4  ;;  %s1008_s6 = int_to_ptr.vmem [resolvable:$false] %s1007_s6 }
  0x54   : > { %s1009_s27 = scalar_lea.vmem %s1008_s6, 1024  ;;  %p1010_p10 = scmp.lt.s32.totalorder %s295_s13, %s1008_s6 }
  0x55   : > { %p1005_p6 = pnand %p1003_p1, %p991_p5  ;;  %p1011_p11 = scmp.lt.s32.totalorder %s1009_s27, %s1002_s0 }
  0x57   : > { %795 = dma.hbm_to_vmem [thread:$0]  (!%p1410_p12), %s1617_s2, 512, %s244_s22, [#allocation7], %s1173_s12, %s1173_s12, %s1174_s23  }
  0x58   : > { %p1006_p3 = pneg %p1005_p6  ;;  %p1012_p7 = por %p1011_p11, %p1010_p10 }
  0x5a   : > { %p1013_p8 = pnand %p1012_p7, %p1006_p3 }
  0x5c   : > { %1016 = shalt.err (!%p1013_p8)
}
  0x5d   : > { %s1176_s17 = smov 384   ;;  %312 = sbr.rel (%p1400_p4) target bundleno = 870 (0x366), region = 48 }
  0x5e   : > { %802 = dma.hbm_to_vmem [thread:$0]  (!%p1351_p0), %s1417_s18, 512, %s295_s13, %s1355_s15, %s1176_s17, %s1173_s12, %s1174_s23  }
  0x5f   : > { %s314_s22 = sand.u32 (!%p1400_p4), 1, %s1363_s16   ;;  %s316_s20 = sand.u32 (!%p1400_p4), 1, %s1145_s8  }
  0x60   : > { %s1436_s1 = sshll.u32 (!%p1400_p4), %s316_s20, 3  ;;  %s315_s2 = scalar_lea.sflag (!%p1400_p4), [#allocation4], %s314_s22 }
  0x61   : > { %s318_s0 = scalar_lea.vmem (!%p1400_p4), [#allocation3], %s1436_s1 }
  0x62   : > { %1100 = dma.done.wait (%p1375_p2), %s315_s2, 128  }
  0x63   : > { %1102 = vsyncadd (%p1375_p2), %s315_s2, 4294967168  ;;  %p1618_p0 = scmp.eq.s32.totalorder %s1363_s16, 0 }
  0x65   : > { %1104 = dma.done.wait (%p1618_p0), [#allocation7], 512   ;;  %p1619_p5 = pmov %p1618_p0 }
  0x66   : > { %s329_s12 = sand.u32 1, %s1133_s28  }
  0x67   : > { %1106 = vsyncadd (%p1619_p5), [#allocation7], 4294966784  ;;  %s736_s13 = sshll.u32 %s329_s12, 5 }
  0x68   : > { %s1448_s11 = scalar_lea.vmem [#allocation8], %s736_s13 }
  0x69   : > { %1108 = dma.done.wait (%p1384_p13), %s315_s2, 512  }
  0x6a   : > { %1110 = vsyncadd (%p1384_p13), %s315_s2, 4294966784  ;;  %s1620_s15 = sld [smem:[#allocation14_spill]]  ;;  %s367_s19 = sand.u32 1, %s1121_s25  }
  0x6b   : > { %s1458_s16 = sshll.u32 %s367_s19, 3  ;;  %s1621_s3 = sld [smem:[#allocation27_spill]] }
  0x6c   : > { %s369_s27 = scalar_lea.vmem [#allocation9], %s1458_s16 }
  0x70   : > { %p370_p2 = scmp.lt.s32.totalorder %s1620_s15, 2  ;;  %p738_p13 = scmp.ne.s32.totalorder %s1620_s15, 0 }
  0x71   : > { %s1622_s22 = sld [smem:[#allocation23_spill]] (!%p738_p13) }
  0x72   : > { %s1461_s21 = scalar_select %p370_p2, %s1620_s15, 2 }
  0x73   : > { %376 = sbr.rel (%p738_p13) target bundleno = 653 (0x28d), region = 64  ;;  %s1623_s2 = sld [smem:[#allocation24_spill]] (!%p738_p13) }
  0x74   : > { %s372_s6 = scalar_lea.vmem %s1621_s3, %s1461_s21  ;;  %s1624_s13 = sld [smem:[#allocation25_spill]] (!%p738_p13) }
  0x78   : > { %v381_v0 = vld [vmem:[#allocation6 + $0x18] sm:$0xff]  ;;  %v1177_v1 = vmov 0.0   ;;  %v380_v2 = vld [vmem:[#allocation6 + $0x10] sm:$0xff]  ;;  %vm1178_vm0 = vmmov 0   ;;  %v379_v3 = vld [vmem:[#allocation6 + $0x8] sm:$0xff]  ;;  %vm389_vm1 = vcmask 261120  }
  0x79   : > { %759 = vmatprep.subr.mxu0 %v1177_v1  ;;  %767 = vmatprep.mubr.msk.f32.mxu0 %vm1178_vm0, %v1177_v1  ;;  %v378_v4 = vld [vmem:[#allocation6] sm:$0xff]  ;;  %v377_v5 = vld [vmem:[%s318_s0] sm:$0xff]  ;;  %v739_v6 = vld [vmem:[%s1622_s22] ss:$0 sm:$0xff] }
  0x7a   : > { %760 = vmatpush3.msra.mxu0 %v381_v0  ;;  %v741_v25 = vld [vmem:[%s1623_s2] ss:$0 sm:$0xff] }
  0x7b   : > { %761 = vmatprep.subr.mxu0 %v1177_v1  ;;  %v742_v27 = vld [vmem:[%s1624_s13] ss:$0 sm:$0xff] }
  0x7c   : > { %762 = vmatpush3.msra.mxu0 %v380_v2 }
  0x7d   : > { %763 = vmatprep.subr.mxu0 %v1177_v1 }
  0x7e   : > { %764 = vmatpush3.msra.mxu0 %v379_v3 }
  0x7f   : > { %765 = vmatprep.subr.mxu0 %v1177_v1 }
  0x80   : > { %766 = vmatpush3.msra.mxu0 %v378_v4 }
  0x81   : > { %768 = vmatmul.mubr.msk.f32.vlgmr.msra.gmra.mxu0 %vm389_vm1, %v377_v5 }
 0x141   : > { %v459_v7 = vpop.f32.mrf.mxu0 }
 0x142   : > { %v460_v8 = vadd.f32 %v739_v6, %v459_v7 }
 0x143   : > { %v769_v9 = vpop.f32.mrf.mxu0 }
 0x144   : > { %v464_v10 = vmul.f32 0.70710677, %v460_v8  ;;  %v463_v12 = vmul.f32 0.5, %v460_v8 }
 0x146   : > { %931 = verf.f32 %v464_v10 }
 0x153   : > { %v932_v11 = vpop.eup %931 }
 0x154   : > { %v466_v13 = vadd.f32 1.0, %v932_v11 }
 0x156   : > { %v467_v14 = vmul.f32 %v466_v13, %v463_v12 }
 0x158   : > { %v468_v15 = vsel %vm389_vm1, %v467_v14, 0.0 }
 0x159   : > { %469 = vadd.xlane.f32.xlu0 %v468_v15 }
 0x1e2   : > { %v470_v16 = vpop.xlane.xlu0 %469 }
 0x1e3   : > { %v472_v17 = vmul.f32 0.03125, %v470_v16 }
 0x1e5   : > { %v473_v18 = vsub.f32 %v467_v14, %v472_v17 }
 0x1e7   : > { %v474_v19 = vmul.f32 %v473_v18, %v473_v18 }
 0x1e9   : > { %v475_v20 = vsel %vm389_vm1, %v474_v19, 0.0 }
 0x1ea   : > { %476 = vadd.xlane.f32.xlu0 %v475_v20 }
 0x273   : > { %v477_v21 = vpop.xlane.xlu0 %476 }
 0x274   : > { %v478_v22 = vmul.f32 0.03125, %v477_v21 }
 0x276   : > { %v479_v23 = vadd.f32 1e-05, %v478_v22 }
 0x278   : > { %933 = vrsqrt.f32 %v479_v23 }
 0x285   : > { %v934_v24 = vpop.eup %933 }
 0x286   : > { %v481_v26 = vmul.f32 %v934_v24, %v473_v18 }
 0x288   : > { %v489_v28 = vmul.f32 %v741_v25, %v481_v26 }
 0x28a   : > { %v497_v29 = vadd.f32 %v742_v27, %v489_v28 }
 0x28c   : > { %498 = vst.msk [vmem:[#allocation2] sm:$0xff] %vm389_vm1, %v497_v29 }
 0x28d PF: > { %v503_v30 = vld [vmem:[%s1448_s11 + $0x18] sm:$0xff]  ;;  %v1179_v31 = vmov 0.0   ;;  %s1625_s15 = sld [smem:[#allocation15_spill]]  ;;  %v502_v32 = vld [vmem:[%s1448_s11 + $0x10] sm:$0xff]  ;;  %vm1180_vm2 = vmmov 0   ;;  %v501_v33 = vld [vmem:[%s1448_s11 + $0x8] sm:$0xff] }
 0x28e   : > { %770 = vmatprep.subr.mxu0 %v1179_v31  ;;  %s1626_s18 = sld [smem:[#allocation14_spill]]  ;;  %778 = vmatprep.mubr.msk.f32.mxu0 %vm1180_vm2, %v1179_v31  ;;  %v500_v34 = vld [vmem:[%s1448_s11] sm:$0xff]  ;;  %vm511_vm3 = vcmask 261120   ;;  %v743_v36 = vld [vmem:[%s372_s6] ss:$0 sm:$0xff]  ;;  %s602_s1 = sshll.u32 %s369_s27, 4  ;;  %s603_s1 = int_to_ptr.vmem [resolvable:$true] %s602_s1 }
 0x28f   : > { %771 = vmatpush3.msra.mxu0 %v503_v30  ;;  %s1628_s0 = sld [smem:[#allocation28_spill]]  ;;  %s587_s13 = scalar_lea.sflag [#allocation5], %s367_s19 }
 0x290   : > { %772 = vmatprep.subr.mxu0 %v1179_v31  ;;  %p1629_p12 = scmp.ne.s32.totalorder %s1612_s10, 0  ;;  %s1181_s21 = smov [#allocation9]  }
 0x291   : > { %773 = vmatpush3.msra.mxu0 %v502_v32  ;;  %s1021_s6 = sshll.u32 %s1181_s21, 4  ;;  %s1022_s6 = int_to_ptr.vmem [resolvable:$false] %s1021_s6 }
 0x292   : > { %774 = vmatprep.subr.mxu0 %v1179_v31  ;;  %p1024_p6 = scmp.lt.s32.totalorder %s603_s1, %s1022_s6 }
 0x293   : > { %775 = vmatpush3.msra.mxu0 %v501_v33  ;;  %v499_v35 = vld [vmem:[#allocation2] sm:$0xff]  ;;  %s781_s23 = smul.u32 3, %s1625_s15  ;;  %s1017_s15 = scalar_lea.vmem %s603_s1, 128 }
 0x294   : > { %776 = vmatprep.subr.mxu0 %v1179_v31  ;;  %p1018_p4 = scmp.ne.s32.totalorder %s603_s1, %s1017_s15 }
 0x295   : > { %777 = vmatpush3.msra.mxu0 %v500_v34  ;;  %s598_s3 = sadd.s32 %s1626_s18, %s781_s23  ;;  %s1023_s18 = scalar_lea.vmem %s1022_s6, 256 }
 0x296   : > { %779 = vmatmul.mubr.msk.f32.vlgmr.msra.gmra.mxu0 %vm511_vm3, %v499_v35  ;;  %s746_s20 = sshll.u32 %s598_s3, 7  ;;  %p1019_p9 = pnand %p1018_p4, %p1629_p12 }
 0x297   : > { %s1500_s12 = scalar_lea.hbm %s1628_s0, %s746_s20  ;;  %p1025_p3 = scmp.lt.s32.totalorder %s1023_s18, %s1017_s15 }
 0x298   : > { %p1020_p1 = pneg %p1019_p9 }
 0x299   : > { %p1026_p10 = por %p1025_p3, %p1024_p6 }
 0x29b   : > { %p1027_p11 = pnand %p1026_p10, %p1020_p1 }
 0x356   : > { %v581_v37 = vpop.f32.mrf.mxu0 }
 0x357   : > { %v582_v38 = vadd.f32 %v743_v36, %v581_v37 }
 0x358   : > { %v780_v39 = vpop.f32.mrf.mxu0 }
 0x359   : > { %585 = vst [vmem:[%s369_s27] sm:$0xff] %v582_v38 }
 0x35a   : > { %1030 = shalt.err (!%p1027_p11)
}
 0x35b   : > { %s1031_s16 = scalar_lea.hbm %s1500_s12, 128  ;;  %s1035_s23 = scalar_lea.hbm %s1628_s0, 768 }
 0x35c   : > { %p1032_p7 = scmp.ne.s32.totalorder %s1500_s12, %s1031_s16  ;;  %p1036_p5 = scmp.lt.s32.totalorder %s1500_s12, %s1628_s0 }
 0x35d   : > { %p1037_p2 = scmp.lt.s32.totalorder %s1035_s23, %s1031_s16 }
 0x35e   : > { %p1033_p8 = pnand %p1032_p7, %p1629_p12 }
 0x35f   : > { %p1038_p13 = por %p1037_p2, %p1036_p5 }
 0x360   : > { %p1034_p0 = pneg %p1033_p8 }
 0x362   : > { %p1039_p4 = pnand %p1038_p13, %p1034_p0 }
 0x364   : > { %1042 = shalt.err (!%p1039_p4)
}
 0x365   : > { %790 = dma.vmem_to_hbm [thread:$0]  (%p1629_p12), %s603_s1, 128, %s1500_s12, %s587_s13  }
 0x366 PF: > { %p810_p9 = scmp.ge.s32.totalorder %s1169_s14, 2  ;;  %s614_s17 = sand.u32 1, %s1117_s24  }
 0x367   : > { %p1630_p1 = scmp.ne.s32.totalorder %s1613_s30, 0  ;;  %s615_s22 = scalar_lea.sflag [#allocation5], %s614_s17 }
 0x369   : > { %p804_p6 = pnand %p810_p9, %p1630_p1 }
 0x36b   : > { %p805_p3 = pneg %p804_p6 }
 0x36d   : > { %1112 = dma.done.wait (%p805_p3), %s615_s22, 128  }
 0x36e   : > { %1114 = vsyncadd (%p805_p3), %s615_s22, 4294967168  ;;  %s24_s14 = sadd.s32 1, %s1169_s14   ;;  %s1632_s10 = sld [smem:[#allocation20_spill]] }
 0x36f   : > { %p1527_p10 = scmp.ge.s32.totalorder %s24_s14, 8   ;;  %s1633_s1 = sld [smem:[#allocation16_spill]] }
 0x370   : > { %s1634_s11 = sld [smem:[#allocation17_spill]]  ;;  %s1637_s24 = smov %s1121_s25 }
 0x371   : > { %s1635_s12 = sld [smem:[#allocation18_spill]]  ;;  %s1638_s25 = smov %s1125_s26 }
 0x372   : > { %s1636_s13 = sld [smem:[#allocation19_spill]]  ;;  %s1639_s26 = smov %s1335_s4 }
 0x373   : > { %s1640_s27 = smov %s1133_s28  ;;  %s1641_s28 = smov %s1137_s29 }
 0x374   : > { %s1642_s29 = smov %s1632_s10  ;;  %s1643_s30 = smov %s1145_s8 }
 0x375   : > { %s1644_s8 = smov %s1149_s9  ;;  %s1645_s9 = smov %s1330_s7 }
 0x376   : > { %s1646_s10 = smov %s1633_s1  ;;  %23 = sbr.rel (!%p1527_p10) target bundleno = 20 (0x14), region = 115 }
 0x37b   :  { %620 = vsyncpa [#allocation4], 1 }
 0x37c   :  { %622 = vsyncpa [#allocation4 + $0x1], 1 }
 0x37d   :  { %623 = vsyncpa [#allocation7], 1 }
 0x37e   :  { %624 = vsyncpa [#allocation5], 1 }
 0x37f   :  { %626 = vsyncpa [#allocation5 + $0x1], 1 }

</bundles_post_ra>
